<compile_context>
chip_gen: v6e
topology: v6e:2x2x1
jax: 0.10.0
libtpu: 0.0.40
codegen_flags: <defaults>
</compile_context>

<pallas_src>
import functools

import jax
import jax.numpy as jnp
from jax.experimental import pallas as pl
from jax.experimental.pallas import tpu as pltpu

HIDDEN_SIZE = 128
LANE = 128  # TPU lane width


def _round_up(n, m):
    return ((n + m - 1) // m) * m


def actor_kernel(x_ref, w1_ref, b1_ref, w2_ref, b2_ref, wh_ref, bh_ref, out_ref):
    """x bf16 (TB, D_in); W* bf16; b* f32; out f32 (TB, 2*O_pad)."""
    o_pad = out_ref.shape[-1] // 2  # static Python int

    # Trunk: Linear -> ReLU -> Linear -> ReLU (bf16 MXU operands, f32 accumulate)
    h = jnp.dot(x_ref[...], w1_ref[...], preferred_element_type=jnp.float32)
    h = jnp.maximum(h + b1_ref[...], 0.0)
    h = jnp.dot(h.astype(jnp.bfloat16), w2_ref[...], preferred_element_type=jnp.float32)
    h = jnp.maximum(h + b2_ref[...], 0.0)

    # Fused heads: single matmul producing [mean_logits | variance_logits]
    heads = jnp.dot(h.astype(jnp.bfloat16), wh_ref[...], preferred_element_type=jnp.float32)
    heads = heads + bh_ref[...]
    m_lin = heads[:, :o_pad]
    v_lin = heads[:, o_pad:]

    # Mean head: Tanh  (lane-aligned 128-wide store, no masking)
    out_ref[:, :o_pad] = jnp.tanh(m_lin)

    # Variance head: Softplus with PyTorch semantics (beta=1, threshold=20)
    sp = jnp.log1p(jnp.exp(jnp.minimum(v_lin, 20.0)))
    out_ref[:, o_pad:] = jnp.where(v_lin > 20.0, v_lin, sp)


def _pack_params(params):
    """Cast weights to bf16, pad each head to 128 lanes, fuse heads into one matrix."""
    w1, b1, w2, b2, wm, bm, wv, bv = params
    O = wm.shape[1]
    O_pad = _round_up(O, LANE)

    def pad_cols(a):
        return jnp.pad(a, ((0, 0), (0, O_pad - a.shape[1])))

    wh = jnp.concatenate([pad_cols(wm), pad_cols(wv)], axis=1)   # (H, 2*O_pad)
    bh = jnp.concatenate([pad_cols(bm), pad_cols(bv)], axis=1)   # (1, 2*O_pad)
    packed = (
        w1.astype(jnp.bfloat16), b1.astype(jnp.float32),
        w2.astype(jnp.bfloat16), b2.astype(jnp.float32),
        wh.astype(jnp.bfloat16), bh.astype(jnp.float32),
    )
    return packed, O, O_pad


@functools.partial(jax.jit, static_argnames=("block_b",))
def actor_forward(x, params, block_b=512):
    """x: (B, D_in) float32. Returns (mean, variance), each (B, O) float32.

    block_b=512 keeps the double-buffered x/out tiles well under v7x's smaller
    VMEM (64 MiB chip / 32 MiB scoped default) while hitting ~85% of HBM roofline.
    """
    B, D_in = x.shape
    packed, O, O_pad = _pack_params(params)
    w1, b1, w2, b2, wh, bh = packed
    H = w1.shape[1]

    # Batch tile: multiple of 8 sublanes; pad B so the grid divides evenly.
    TB = block_b if B >= block_b else _round_up(B, 8)
    B_pad = _round_up(B, TB)

    xb = x.astype(jnp.bfloat16)
    if B_pad != B:
        xb = jnp.pad(xb, ((0, B_pad - B), (0, 0)))

    out = pl.pallas_call(
        actor_kernel,
        out_shape=jax.ShapeDtypeStruct((B_pad, 2 * O_pad), jnp.float32),
        grid_spec=pltpu.PrefetchScalarGridSpec(
            num_scalar_prefetch=0,
            grid=(B_pad // TB,),
            in_specs=[
                pl.BlockSpec((TB, D_in), lambda i: (i, 0)),        # x: tiled over batch
                pl.BlockSpec((D_in, H), lambda i: (0, 0)),         # W1: VMEM-resident
                pl.BlockSpec((1, H), lambda i: (0, 0)),            # b1
                pl.BlockSpec((H, H), lambda i: (0, 0)),            # W2
                pl.BlockSpec((1, H), lambda i: (0, 0)),            # b2
                pl.BlockSpec((H, 2 * O_pad), lambda i: (0, 0)),    # fused head weights
                pl.BlockSpec((1, 2 * O_pad), lambda i: (0, 0)),    # fused head biases
            ],
            out_specs=pl.BlockSpec((TB, 2 * O_pad), lambda i: (i, 0)),
        ),
        compiler_params=pltpu.CompilerParams(
            dimension_semantics=("parallel",),  # shard batch grid across TCs (v7x)
        ),
    )(xb, w1, b1, w2, b2, wh, bh)

    mean = out[:B, :O]
    var = out[:B, O_pad:O_pad + O]
    return mean, var


def init_params(key, input_shape, output_shape):
    """PyTorch-style uniform init U[-1/sqrt(fan_in), 1/sqrt(fan_in)].
    Weights stored already transposed to (in, out)."""
    def linear(key, fan_in, fan_out):
        kw, kb = jax.random.split(key)
        bound = 1.0 / jnp.sqrt(fan_in)
        w = jax.random.uniform(kw, (fan_in, fan_out), jnp.float32, -bound, bound)
        b = jax.random.uniform(kb, (1, fan_out), jnp.float32, -bound, bound)
        return w, b

    k1, k2, k3, k4 = jax.random.split(key, 4)
    w1, b1 = linear(k1, input_shape, HIDDEN_SIZE)
    w2, b2 = linear(k2, HIDDEN_SIZE, HIDDEN_SIZE)
    wm, bm = linear(k3, HIDDEN_SIZE, output_shape)
    wv, bv = linear(k4, HIDDEN_SIZE, output_shape)
    return (w1, b1, w2, b2, wm, bm, wv, bv)


def actor_reference(x, params):
    """Pure-JAX f32 reference for correctness check."""
    w1, b1, w2, b2, wm, bm, wv, bv = params
    h = jnp.maximum(x @ w1 + b1, 0.0)
    h = jnp.maximum(h @ w2 + b2, 0.0)
    mean = jnp.tanh(h @ wm + bm)
    v = h @ wv + bv
    var = jnp.where(v > 20.0, v, jnp.log1p(jnp.exp(jnp.minimum(v, 20.0))))
    return mean, var


if __name__ == "__main__":
    key = jax.random.PRNGKey(0)
    kx, kp = jax.random.split(key)

    batch = 8
    input_shape = 16   # observation dim
    output_shape = 4   # action dim

    x = jax.random.normal(kx, (batch, input_shape), jnp.float32)
    params = init_params(kp, input_shape, output_shape)

    mean, var = actor_forward(x, params)
    jax.block_until_ready((mean, var))

    ref_mean, ref_var = actor_reference(x, params)
    assert mean.shape == (batch, output_shape) and var.shape == (batch, output_shape)
    # bf16 MXU operands vs f32 reference -> looser tolerance (per review guidance).
    assert jnp.allclose(mean, ref_mean, atol=3e-2, rtol=3e-2), "mean mismatch"
    assert jnp.allclose(var, ref_var, atol=3e-2, rtol=3e-2), "variance mismatch"

    print("KERNEL_OK")
</pallas_src>

<mosaic_0001>
module attributes {stable_mosaic.version = 11 : i64} {
  func.func @actor_kernel(%arg0: i32, %arg1: memref<8x16xbf16, #tpu.memory_space<vmem>>, %arg2: memref<16x128xbf16, #tpu.memory_space<vmem>>, %arg3: memref<1x128xf32, #tpu.memory_space<vmem>>, %arg4: memref<128x128xbf16, #tpu.memory_space<vmem>>, %arg5: memref<1x128xf32, #tpu.memory_space<vmem>>, %arg6: memref<128x256xbf16, #tpu.memory_space<vmem>>, %arg7: memref<1x256xf32, #tpu.memory_space<vmem>>, %arg8: memref<8x256xf32, #tpu.memory_space<vmem>>) attributes {dimension_semantics = [#tpu.dimension_semantics<parallel>], iteration_bounds = array<i64: 1>, scalar_prefetch = 0 : i64, scratch_operands = 0 : i64, tpu.core_type = #tpu.core_type<tc>, window_params = [{transform_indices = @transform_0, window_bounds = array<i64: 8, 16>}, {pipeline_mode = #tpu.pipeline_mode<synchronous>, transform_indices = @transform_1, window_bounds = array<i64: 16, 128>}, {pipeline_mode = #tpu.pipeline_mode<synchronous>, transform_indices = @transform_2, window_bounds = array<i64: 1, 128>}, {pipeline_mode = #tpu.pipeline_mode<synchronous>, transform_indices = @transform_3, window_bounds = array<i64: 128, 128>}, {pipeline_mode = #tpu.pipeline_mode<synchronous>, transform_indices = @transform_4, window_bounds = array<i64: 1, 128>}, {pipeline_mode = #tpu.pipeline_mode<synchronous>, transform_indices = @transform_5, window_bounds = array<i64: 128, 256>}, {pipeline_mode = #tpu.pipeline_mode<synchronous>, transform_indices = @transform_6, window_bounds = array<i64: 1, 256>}, {transform_indices = @transform_7, window_bounds = array<i64: 8, 256>}]} {
    %c0 = arith.constant 0 : index
    %c0_0 = arith.constant 0 : index
    %0 = vector.load %arg1[%c0, %c0_0] : memref<8x16xbf16, #tpu.memory_space<vmem>>, vector<8x16xbf16>
    %c0_1 = arith.constant 0 : index
    %c0_2 = arith.constant 0 : index
    %1 = vector.load %arg2[%c0_1, %c0_2] : memref<16x128xbf16, #tpu.memory_space<vmem>>, vector<16x128xbf16>
    %cst = arith.constant dense<0.000000e+00> : vector<8x128xf32>
    %2 = tpu.matmul %0, %1, %cst {dimension_numbers = #tpu.dot_dimension_numbers<[1], [0], [0], [1], [0, 0, 1, 1], [], []>} : vector<8x16xbf16>, vector<16x128xbf16>, vector<8x128xf32> -> vector<8x128xf32>
    %c0_3 = arith.constant 0 : index
    %c0_4 = arith.constant 0 : index
    %3 = vector.load %arg3[%c0_3, %c0_4] : memref<1x128xf32, #tpu.memory_space<vmem>>, vector<1x128xf32>
    %4 = vector.broadcast %3 : vector<1x128xf32> to vector<8x128xf32>
    %5 = arith.addf %2, %4 : vector<8x128xf32>
    %cst_5 = arith.constant 0.000000e+00 : f32
    %6 = vector.broadcast %cst_5 : f32 to vector<8x128xf32>
    %7 = arith.maximumf %5, %6 : vector<8x128xf32>
    %8 = arith.truncf %7 : vector<8x128xf32> to vector<8x128xbf16>
    %c0_6 = arith.constant 0 : index
    %c0_7 = arith.constant 0 : index
    %9 = vector.load %arg4[%c0_6, %c0_7] : memref<128x128xbf16, #tpu.memory_space<vmem>>, vector<128x128xbf16>
    %cst_8 = arith.constant dense<0.000000e+00> : vector<8x128xf32>
    %10 = tpu.matmul %8, %9, %cst_8 {dimension_numbers = #tpu.dot_dimension_numbers<[1], [0], [0], [1], [0, 0, 1, 1], [], []>} : vector<8x128xbf16>, vector<128x128xbf16>, vector<8x128xf32> -> vector<8x128xf32>
    %c0_9 = arith.constant 0 : index
    %c0_10 = arith.constant 0 : index
    %11 = vector.load %arg5[%c0_9, %c0_10] : memref<1x128xf32, #tpu.memory_space<vmem>>, vector<1x128xf32>
    %12 = vector.broadcast %11 : vector<1x128xf32> to vector<8x128xf32>
    %13 = arith.addf %10, %12 : vector<8x128xf32>
    %cst_11 = arith.constant 0.000000e+00 : f32
    %14 = vector.broadcast %cst_11 : f32 to vector<8x128xf32>
    %15 = arith.maximumf %13, %14 : vector<8x128xf32>
    %16 = arith.truncf %15 : vector<8x128xf32> to vector<8x128xbf16>
    %c0_12 = arith.constant 0 : index
    %c0_13 = arith.constant 0 : index
    %17 = vector.load %arg6[%c0_12, %c0_13] : memref<128x256xbf16, #tpu.memory_space<vmem>>, vector<128x256xbf16>
    %cst_14 = arith.constant dense<0.000000e+00> : vector<8x256xf32>
    %18 = tpu.matmul %16, %17, %cst_14 {dimension_numbers = #tpu.dot_dimension_numbers<[1], [0], [0], [1], [0, 0, 1, 1], [], []>} : vector<8x128xbf16>, vector<128x256xbf16>, vector<8x256xf32> -> vector<8x256xf32>
    %c0_15 = arith.constant 0 : index
    %c0_16 = arith.constant 0 : index
    %19 = vector.load %arg7[%c0_15, %c0_16] : memref<1x256xf32, #tpu.memory_space<vmem>>, vector<1x256xf32>
    %20 = vector.broadcast %19 : vector<1x256xf32> to vector<8x256xf32>
    %21 = arith.addf %18, %20 : vector<8x256xf32>
    %22 = vector.extract_strided_slice %21 {offsets = [0, 0], sizes = [8, 128], strides = [1, 1]} : vector<8x256xf32> to vector<8x128xf32>
    %23 = vector.extract_strided_slice %21 {offsets = [0, 128], sizes = [8, 128], strides = [1, 1]} : vector<8x256xf32> to vector<8x128xf32>
    %24 = math.tanh %22 : vector<8x128xf32>
    %c0_17 = arith.constant 0 : index
    %c0_18 = arith.constant 0 : index
    %25 = vector.load %arg8[%c0_17, %c0_18] : memref<8x256xf32, #tpu.memory_space<vmem>>, vector<8x128xf32>
    tpu.vector_store %arg8[%c0_17, %c0_18], %24 {strides = array<i32>} : memref<8x256xf32, #tpu.memory_space<vmem>>, vector<8x128xf32>,
    %cst_19 = arith.constant 2.000000e+01 : f32
    %26 = vector.broadcast %cst_19 : f32 to vector<8x128xf32>
    %27 = arith.minimumf %23, %26 : vector<8x128xf32>
    %28 = math.exp %27 : vector<8x128xf32>
    %29 = math.log1p %28 : vector<8x128xf32>
    %cst_20 = arith.constant 2.000000e+01 : f32
    %30 = vector.broadcast %cst_20 : f32 to vector<8x128xf32>
    %31 = arith.cmpf ogt, %23, %30 : vector<8x128xf32>
    %32 = arith.select %31, %23, %29 : vector<8x128xi1>, vector<8x128xf32>
    %c0_21 = arith.constant 0 : index
    %c128 = arith.constant 128 : index
    %33 = vector.load %arg8[%c0_21, %c128] : memref<8x256xf32, #tpu.memory_space<vmem>>, vector<8x128xf32>
    tpu.vector_store %arg8[%c0_21, %c128], %32 {strides = array<i32>} : memref<8x256xf32, #tpu.memory_space<vmem>>, vector<8x128xf32>,
    return
  }
  func.func @transform_0(%arg0: i32) -> (i32, i32) {
    %c0_i32 = arith.constant 0 : i32
    %c0_i32_0 = arith.constant 0 : i32
    return %arg0, %c0_i32 : i32, i32
  }
  func.func @transform_1(%arg0: i32) -> (i32, i32) {
    %c0_i32 = arith.constant 0 : i32
    %c0_i32_0 = arith.constant 0 : i32
    %c0_i32_1 = arith.constant 0 : i32
    return %c0_i32, %c0_i32_0 : i32, i32
  }
  func.func @transform_2(%arg0: i32) -> (i32, i32) {
    %c0_i32 = arith.constant 0 : i32
    %c0_i32_0 = arith.constant 0 : i32
    %c0_i32_1 = arith.constant 0 : i32
    return %c0_i32, %c0_i32_0 : i32, i32
  }
  func.func @transform_3(%arg0: i32) -> (i32, i32) {
    %c0_i32 = arith.constant 0 : i32
    %c0_i32_0 = arith.constant 0 : i32
    %c0_i32_1 = arith.constant 0 : i32
    return %c0_i32, %c0_i32_0 : i32, i32
  }
  func.func @transform_4(%arg0: i32) -> (i32, i32) {
    %c0_i32 = arith.constant 0 : i32
    %c0_i32_0 = arith.constant 0 : i32
    %c0_i32_1 = arith.constant 0 : i32
    return %c0_i32, %c0_i32_0 : i32, i32
  }
  func.func @transform_5(%arg0: i32) -> (i32, i32) {
    %c0_i32 = arith.constant 0 : i32
    %c0_i32_0 = arith.constant 0 : i32
    %c0_i32_1 = arith.constant 0 : i32
    return %c0_i32, %c0_i32_0 : i32, i32
  }
  func.func @transform_6(%arg0: i32) -> (i32, i32) {
    %c0_i32 = arith.constant 0 : i32
    %c0_i32_0 = arith.constant 0 : i32
    %c0_i32_1 = arith.constant 0 : i32
    return %c0_i32, %c0_i32_0 : i32, i32
  }
  func.func @transform_7(%arg0: i32) -> (i32, i32) {
    %c0_i32 = arith.constant 0 : i32
    %c0_i32_0 = arith.constant 0 : i32
    return %arg0, %c0_i32 : i32, i32
  }
}

</mosaic_0001>

<bundles_post_ra>
// kernel: actor_forward.1
= control target key start
LH: loop header
LB: loop body
LE: loop exit
PB: predicated region body
PF: predicated region fallthrough
CT: control target
= control target key end

     0   :  { %v479_v0 = vmov 0.0   ;;  %vm480_vm0 = vmmov 0   ;;  %vm43_vm1 = vcmask 130048   ;;  %v481_v35 = vmov 0   ;;  %s615_s1 = inlined_call_operand.vmem [shape: bf16[16,128], index: 1, kind: input, shape index: {}]   ;;  %s616_s0 = inlined_call_operand.vmem [shape: bf16[8,16], index: 0, kind: input, shape index: {}]   ;;  %s617_s3 = inlined_call_operand.vmem [shape: bf16[128,128], index: 3, kind: input, shape index: {}]   ;;  %s618_s5 = inlined_call_operand.vmem [shape: bf16[128,256], index: 5, kind: input, shape index: {}]   ;;  %s619_s2 = inlined_call_operand.vmem [shape: f32[1,128], index: 2, kind: input, shape index: {}]   ;;  %s620_s4 = inlined_call_operand.vmem [shape: f32[1,128], index: 4, kind: input, shape index: {}]   ;;  %s621_s6 = inlined_call_operand.vmem [shape: f32[1,256], index: 6, kind: input, shape index: {}]   ;;  %s622_s7 = inlined_call_operand.vmem [shape: f32[8,256], index: 7, kind: output, shape index: {}]  }
   0x1   :  { %411 = vmatprep.subr.bf16.mxu0 %v479_v0  ;;  %v440_v1 = vld [vmem:[%s615_s1] sm:$0xff]   ;;  %413 = vmatprep.mubr.msk.bf16.mxu0 %vm480_vm0, %v479_v0  ;;  %v441_v3 = vld [vmem:[%s617_s3 + $0x38] sm:$0xff]   ;;  %v442_v4 = vld [vmem:[%s617_s3 + $0x30] sm:$0xff]   ;;  %v220_v44 = vlaneseq }
   0x2   :  { %v27_v2 = vld [vmem:[%s616_s0] sm:$0xf]  ;;  %417 = vmatprep.subr.bf16.mxu1 %v479_v0  ;;  %433 = vmatprep.mubr.msk.bf16.mxu1 %vm480_vm0, %v479_v0  ;;  %v443_v5 = vld [vmem:[%s617_s3 + $0x28] sm:$0xff]   ;;  %v445_v7 = vld [vmem:[%s617_s3 + $0x18] sm:$0xff]  }
   0x3   :  { %412 = vmatpush3.bf16.msra.mxu0 %v440_v1  ;;  %418 = vmatpush3.bf16.msra.mxu1 %v441_v3  ;;  %v444_v6 = vld [vmem:[%s617_s3 + $0x20] sm:$0xff]   ;;  %v446_v8 = vld [vmem:[%s617_s3 + $0x10] sm:$0xff]   ;;  %v447_v9 = vld [vmem:[%s617_s3 + $0x8] sm:$0xff]   ;;  %v221_v45 = vshrl.u32 %v220_v44, 7 }
   0x4   :  { %419 = vmatprep.subr.bf16.mxu1 %v479_v0  ;;  %v448_v10 = vld [vmem:[%s617_s3] sm:$0xff]   ;;  %v449_v11 = vld [vmem:[%s618_s5 + $0x70] ss:$8 sps:$4 sm:$0xff]   ;;  %v451_v12 = vld [vmem:[%s618_s5 + $0x74] ss:$8 sps:$4 sm:$0xff]  }
   0x5   :  { %v454_v13 = vld [vmem:[%s618_s5 + $0x64] ss:$8 sps:$4 sm:$0xff]   ;;  %310 = vmatprep.subr.bf16.mxu0 %v451_v12  ;;  %v452_v14 = vld [vmem:[%s618_s5 + $0x60] ss:$8 sps:$4 sm:$0xff]   ;;  %v457_v15 = vld [vmem:[%s618_s5 + $0x54] ss:$8 sps:$4 sm:$0xff]  }
   0x6   :  { %414 = vmatmul.mubr.msk.bf16.vlgmr.msra.gmra.mxu0 %vm43_vm1, %v27_v2  ;;  %v455_v16 = vld [vmem:[%s618_s5 + $0x50] ss:$8 sps:$4 sm:$0xff]   ;;  %v460_v17 = vld [vmem:[%s618_s5 + $0x44] ss:$8 sps:$4 sm:$0xff]   ;;  %v458_v18 = vld [vmem:[%s618_s5 + $0x40] ss:$8 sps:$4 sm:$0xff]  }
   0x7   :  { %420 = vmatpush3.bf16.msra.mxu1 %v442_v4  ;;  %311 = vmatpush1.bf16.msra.mxu0 %v449_v11  ;;  %v463_v19 = vld [vmem:[%s618_s5 + $0x34] ss:$8 sps:$4 sm:$0xff]   ;;  %v461_v20 = vld [vmem:[%s618_s5 + $0x30] ss:$8 sps:$4 sm:$0xff]   ;;  %v466_v21 = vld [vmem:[%s618_s5 + $0x24] ss:$8 sps:$4 sm:$0xff]  }
   0x8   :  { %421 = vmatprep.subr.bf16.mxu1 %v479_v0  ;;  %312 = vmatprep.subr.bf16.mxu0 %v454_v13  ;;  %v464_v22 = vld [vmem:[%s618_s5 + $0x20] ss:$8 sps:$4 sm:$0xff]   ;;  %v469_v23 = vld [vmem:[%s618_s5 + $0x14] ss:$8 sps:$4 sm:$0xff]   ;;  %v467_v24 = vld [vmem:[%s618_s5 + $0x10] ss:$8 sps:$4 sm:$0xff]  }
   0x9   :  { %v372_v25 = vld [vmem:[%s619_s2] ss:$0 sm:$0xff]  ;;  %v472_v33 = vld [vmem:[%s618_s5 + $0x4] ss:$8 sps:$4 sm:$0xff]   ;;  %342 = vmatprep.mubr.bf16.mxu0 %v481_v35  ;;  %v222_v46 = vsub.s32 0, %v221_v45  ;;  %v226_v48 = vsub.s32 1, %v221_v45 }
   0xa   :  { %v470_v34 = vld [vmem:[%s618_s5] ss:$8 sps:$4 sm:$0xff]  }
   0xb   :  { %422 = vmatpush3.bf16.msra.mxu1 %v443_v5  ;;  %313 = vmatpush1.bf16.msra.mxu0 %v452_v14  ;;  %v375_v36 = vld [vmem:[%s620_s4] ss:$0 sm:$0xff] }
   0xc   :  { %423 = vmatprep.subr.bf16.mxu1 %v479_v0  ;;  %314 = vmatprep.subr.bf16.mxu0 %v457_v15  ;;  %v218_v47 = vld [vmem:[%s621_s6] sm:$0x3] }
   0xd   :  { %v223_v49 = vrot.slane %v218_v47, %v222_v46  ;;  %v227_v50 = vrot.slane %v218_v47, %v226_v48 }
   0xf   :  { %424 = vmatpush3.bf16.msra.mxu1 %v444_v6  ;;  %315 = vmatpush1.bf16.msra.mxu0 %v455_v16 }
  0x10   :  { %425 = vmatprep.subr.bf16.mxu1 %v479_v0  ;;  %316 = vmatprep.subr.bf16.mxu0 %v460_v17 }
  0x13   :  { %426 = vmatpush3.bf16.msra.mxu1 %v445_v7  ;;  %317 = vmatpush1.bf16.msra.mxu0 %v458_v18 }
  0x14   :  { %427 = vmatprep.subr.bf16.mxu1 %v479_v0  ;;  %318 = vmatprep.subr.bf16.mxu0 %v463_v19 }
  0x17   :  { %428 = vmatpush3.bf16.msra.mxu1 %v446_v8  ;;  %319 = vmatpush1.bf16.msra.mxu0 %v461_v20 }
  0x18   :  { %429 = vmatprep.subr.bf16.mxu1 %v479_v0  ;;  %320 = vmatprep.subr.bf16.mxu0 %v466_v21 }
  0x1b   :  { %430 = vmatpush3.bf16.msra.mxu1 %v447_v9  ;;  %321 = vmatpush1.bf16.msra.mxu0 %v464_v22 }
  0x1c   :  { %431 = vmatprep.subr.bf16.mxu1 %v479_v0  ;;  %322 = vmatprep.subr.bf16.mxu0 %v469_v23 }
  0x1f   :  { %432 = vmatpush3.bf16.msra.mxu1 %v448_v10  ;;  %323 = vmatpush1.bf16.msra.mxu0 %v467_v24 }
  0x20   :  { %324 = vmatprep.subr.bf16.mxu0 %v472_v33 }
  0x23   :  { %325 = vmatpush1.bf16.msra.mxu0 %v470_v34 }
  0xc6   :  { %v81_v26 = vpop.f32.mrf.mxu0 }
  0xc7   :  { %v82_v27 = vadd.f32 %v372_v25, %v81_v26 }
  0xc8   :  { %v415_v28 = vpop.f32.mrf.mxu0 }
  0xc9   :  { %v87_v29 = vmax.f32 %v82_v27, 0.0 }
  0xca   :  { %v84_v30 = vpop.f32.mrf.mxu0 }
  0xcb   :  { %v88_v31 = vpack.c.bf16 %v87_v29, %v87_v29 }
  0xcc   :  { %v416_v32 = vpop.f32.mrf.mxu0 }
  0xcd   :  { %434 = vmatmul.mubr.bf16.vlgmr.msra.gmra.mxu1 %v88_v31 }
 0x18d   :  { %v194_v37 = vpop.f32.mrf.mxu1 }
 0x18e   :  { %v195_v38 = vadd.f32 %v375_v36, %v194_v37 }
 0x18f   :  { %v435_v39 = vpop.f32.mrf.mxu1 }
 0x190   :  { %v200_v40 = vmax.f32 %v195_v38, 0.0 }
 0x191   :  { %v197_v41 = vpop.f32.mrf.mxu1 }
 0x192   :  { %v201_v42 = vpack.c.bf16 %v200_v40, %v200_v40 }
 0x193   :  { %v436_v43 = vpop.f32.mrf.mxu1 }
 0x194   :  { %343 = vmatmul.mubr.bf16.vlgmr.msra.gmra.mxu0 %v201_v42 }
 0x254   :  { %v344_v51 = vpop.f32.mrf.mxu0 }
 0x255   :  { %v345_v52 = vadd.f32 %v344_v51, %v223_v49 }
 0x256   :  { %v346_v53 = vpop.f32.mrf.mxu0 }
 0x257   :  { %473 = vtanh.f32 %v345_v52  ;;  %v347_v54 = vadd.f32 %v346_v53, %v227_v50 }
 0x258   :  { %v348_v55 = vpop.f32.mrf.mxu0 }
 0x259   :  { %v353_v56 = vmin.f32 %v347_v54, 20.0  ;;  %vm365_vm3 = vcmp.gt.f32.partialorder %v347_v54, 20.0 }
 0x25a   :  { %v349_v57 = vpop.f32.mrf.mxu0 }
 0x25b   :  { %v354_v58 = vmul.f32 1.442695, %v353_v56 }
 0x25d   :  { %475 = vpow2.f32 %v354_v58 }
 0x264   :  { %v474_v59 = vpop.eup %473 }
 0x265   :  { %352 = vst [vmem:[%s622_s7] sm:$0xff] %v474_v59 }
 0x26a   :  { %v476_v60 = vpop.eup %475 }
 0x26b   :  { %v356_v61 = vadd.f32 1.0, %v476_v60  ;;  %v359_v62 = vmul.f32 -0.5, %v476_v60  ;;  %v362_v0 = vand.u32 2147483647, %v476_v60 }
 0x26d   :  { %477 = vlog2.f32 %v356_v61  ;;  %v360_v63 = vadd.f32 1.0, %v359_v62  ;;  %vm363_vm2 = vcmp.lt.f32.partialorder %v362_v0, 0.0004427343 }
 0x26f   :  { %v361_v3 = vmul.f32 %v476_v60, %v360_v63 }
 0x27a   :  { %v478_v1 = vpop.eup %477 }
 0x27b   :  { %v358_v2 = vmul.f32 0.6931472, %v478_v1 }
 0x27d   :  { %v364_v4 = vsel %vm363_vm2, %v361_v3, %v358_v2 }
 0x27e   :  { %v366_v5 = vsel %vm365_vm3, %v347_v54, %v364_v4 }
 0x27f   :  { %367 = vst [vmem:[%s622_s7 + $0x8] sm:$0xff] %v366_v5 }

</bundles_post_ra>
